<compile_context>
chip_gen: v5e
topology: v5e:2x2
jax: 0.10.0
libtpu: 0.0.40
codegen_flags: <defaults>
</compile_context>

<pallas_src>
import functools
import math

import jax
import jax.numpy as jnp
from jax.experimental import pallas as pl
from jax.experimental.pallas import tpu as pltpu

WBITS = 4
GROUP_SIZE = 64


def _round_up(x, m):
    return ((x + m - 1) // m) * m


# ---------------------------------------------------------------------------
# Kernels
# ---------------------------------------------------------------------------
def _qlinear_dequant_kernel(x_ref, q_ref, scale_ref, zp_ref, b_ref, o_ref,
                            acc_ref, wdq_ref, *, group_size, mxu_dtype):
    """Fused (int8 codes -> bf16 dequant) + matmul, fp32 accumulation.

    x_ref     : (tm, tk)  activations, already in mxu_dtype.
    q_ref     : (tk, tn)  int8 codes in [0, 2^b-1], weight in (K, N) layout.
    scale_ref : (ng, tn)  fp32 per-group scale, ng = tk // group_size.
    zp_ref    : (ng, tn)  fp32 per-group zero point.
    b_ref     : (1, tn)   fp32 bias.
    o_ref     : (tm, tn)  output tile.
    acc_ref   : (tm, tn)  fp32 accumulator scratch.
    wdq_ref   : (tk, tn)  dequantized-weight scratch in mxu_dtype.
    """
    @pl.when(pl.program_id(2) == 0)
    def _init():
        acc_ref[...] = jnp.zeros_like(acc_ref)

    n_groups = q_ref.shape[0] // group_size
    # One 64-sublane x tn-lane slab per group.  Static, full-lane slices
    # (tn is a multiple of 128) -> unmasked loads/stores; the (1, tn) scale/zp
    # rows broadcast across sublanes for free; nothing bigger than one group
    # slab is ever live in vregs.
    for g in range(n_groups):
        rows = slice(g * group_size, (g + 1) * group_size)
        qg = q_ref[rows, :].astype(jnp.float32)           # int8 -> f32
        s = scale_ref[g:g + 1, :]
        zp = zp_ref[g:g + 1, :]
        wdq_ref[rows, :] = ((qg - zp) * s).astype(mxu_dtype)

    acc_ref[...] += jnp.dot(x_ref[...], wdq_ref[...],
                            preferred_element_type=jnp.float32)

    @pl.when(pl.program_id(2) == pl.num_programs(2) - 1)
    def _finalize():
        o_ref[...] = (acc_ref[...] + b_ref[...]).astype(o_ref.dtype)


def _linear_kernel(x_ref, w_ref, b_ref, o_ref, acc_ref):
    """Plain (non-quantized) tiled matmul, fp32 accumulation."""
    @pl.when(pl.program_id(2) == 0)
    def _init():
        acc_ref[...] = jnp.zeros_like(acc_ref)

    acc_ref[...] += jnp.dot(x_ref[...], w_ref[...],
                            preferred_element_type=jnp.float32)

    @pl.when(pl.program_id(2) == pl.num_programs(2) - 1)
    def _finalize():
        o_ref[...] = (acc_ref[...] + b_ref[...]).astype(o_ref.dtype)


# ---------------------------------------------------------------------------
# One-time quantizer pre-pass (plain XLA) — matches UniformAffineQuantizer.
# ---------------------------------------------------------------------------
def _fake_quant_params(weight, wbits, group_size):
    """Returns int8 codes q (out,in) and fp32 scale/zp (out, in//group_size).

    (q - zp) * scale reproduces the reference fake-quantized weight; q is a
    small integer (0..2^b-1), exactly representable, so the in-kernel dequant
    is bit-for-bit the same fp32 math as the reference quantizer."""
    out_f, in_f = weight.shape
    qmax = float(2 ** wbits - 1)
    wg = weight.astype(jnp.float32).reshape(out_f, in_f // group_size, group_size)
    xmax = wg.max(axis=-1)
    xmin = wg.min(axis=-1)
    scale = jnp.maximum(xmax - xmin, 1e-5) / qmax
    zp = jnp.round(-xmin / scale)
    q = jnp.clip(jnp.round(wg / scale[..., None]) + zp[..., None], 0.0, qmax)
    q = q.astype(jnp.int8).reshape(out_f, in_f)
    return q, scale, zp


# ---------------------------------------------------------------------------
# Wrapper: tiling, padding, pallas_call plumbing.
# ---------------------------------------------------------------------------
def _quant_linear_pallas(x2d, weight, bias, *, quantize, wbits=WBITS,
                         group_size=GROUP_SIZE, mxu_dtype=jnp.bfloat16,
                         tm=256, tn=256, tk=1024):
    M, K = x2d.shape
    N, K2 = weight.shape
    assert K == K2, "in_features mismatch"
    out_dtype = x2d.dtype
    mxu_dtype = jnp.dtype(mxu_dtype)

    # ---- tile selection ----------------------------------------------------
    tm_unit = 16 if mxu_dtype.itemsize < 4 else 8    # bf16 packs 16 sublanes
    tm = min(tm, _round_up(M, tm_unit))
    n128 = _round_up(N, 128)
    tn = min(tn, n128)
    # v7x has 2 TensorCores: for small-M (decode-like) shapes make sure the N
    # "parallel" axis has >= 2 tiles so both cores get work.
    if _round_up(M, tm) <= tm and n128 >= 2 * 128:
        tn = min(tn, 128)

    if quantize:
        assert K % group_size == 0, "in_features must be divisible by group_size"
        unit = math.lcm(128, group_size)
        if _round_up(K, unit) <= tk:
            tk = _round_up(K, unit)                    # single K tile
        else:
            # multi K tile: tk//group_size must be a multiple of 8 (sublane
            # rule on the (ng, tn) stats blocks) and tk a multiple of 128.
            step = math.lcm(128, 8 * group_size)
            tk = max(step, (tk // step) * step)
    else:
        tk = min(tk, _round_up(K, 128))

    Mp, Np, Kp = _round_up(M, tm), _round_up(N, tn), _round_up(K, tk)
    grid = (Mp // tm, Np // tn, Kp // tk)

    # ---- operand preparation (plain XLA, once per call) ---------------------
    # Cast x to the MXU dtype here (halves x HBM traffic, removes a per-step
    # full-tile cast in the kernel).  Zero padding is exact: padded K columns
    # of x are zero so any finite padded weight row contributes nothing.
    x2d = x2d.astype(mxu_dtype)
    if (Mp, Kp) != (M, K):
        x2d = jnp.pad(x2d, ((0, Mp - M), (0, Kp - K)))
    b2d = jnp.pad(bias.astype(jnp.float32), (0, Np - N)).reshape(1, Np)

    common = dict(
        out_shape=jax.ShapeDtypeStruct((Mp, Np), out_dtype),
        compiler_params=pltpu.CompilerParams(
            dimension_semantics=("parallel", "parallel", "arbitrary"),
            vmem_limit_bytes=32 * 1024 * 1024,
        ),
    )

    if quantize:
        ng = tk // group_size
        G, Gp = K // group_size, Kp // group_size
        q, scale, zp = _fake_quant_params(weight, wbits, group_size)
        # (K, N) layouts: groups run along sublanes.  Padded rows/cols are
        # q=0, scale=0, zp=0 -> dequantize to exactly 0.
        q_t = jnp.pad(q.T, ((0, Kp - K), (0, Np - N)))
        scale_t = jnp.pad(scale.T, ((0, Gp - G), (0, Np - N)))
        zp_t = jnp.pad(zp.T, ((0, Gp - G), (0, Np - N)))

        kern = functools.partial(_qlinear_dequant_kernel,
                                 group_size=group_size, mxu_dtype=mxu_dtype)
        out = pl.pallas_call(
            kern,
            grid_spec=pltpu.PrefetchScalarGridSpec(
                num_scalar_prefetch=0,
                grid=grid,
                in_specs=[
                    pl.BlockSpec((tm, tk), lambda i, j, k: (i, k)),   # x
                    pl.BlockSpec((tk, tn), lambda i, j, k: (k, j)),   # q int8
                    pl.BlockSpec((ng, tn), lambda i, j, k: (k, j)),   # scale
                    pl.BlockSpec((ng, tn), lambda i, j, k: (k, j)),   # zp
                    pl.BlockSpec((1, tn), lambda i, j, k: (0, j)),    # bias
                ],
                out_specs=pl.BlockSpec((tm, tn), lambda i, j, k: (i, j)),
                scratch_shapes=[
                    pltpu.VMEM((tm, tn), jnp.float32),   # fp32 accumulator
                    pltpu.VMEM((tk, tn), mxu_dtype),     # dequantized weight
                ],
            ),
            **common,
        )(x2d, q_t, scale_t, zp_t, b2d)
    else:
        w_t = jnp.pad(weight.T.astype(mxu_dtype), ((0, Kp - K), (0, Np - N)))
        out = pl.pallas_call(
            _linear_kernel,
            grid_spec=pltpu.PrefetchScalarGridSpec(
                num_scalar_prefetch=0,
                grid=grid,
                in_specs=[
                    pl.BlockSpec((tm, tk), lambda i, j, k: (i, k)),
                    pl.BlockSpec((tk, tn), lambda i, j, k: (k, j)),
                    pl.BlockSpec((1, tn), lambda i, j, k: (0, j)),
                ],
                out_specs=pl.BlockSpec((tm, tn), lambda i, j, k: (i, j)),
                scratch_shapes=[pltpu.VMEM((tm, tn), jnp.float32)],
            ),
            **common,
        )(x2d, w_t, b2d)

    return out[:M, :N]


# ---------------------------------------------------------------------------
# QuantLinear.forward equivalent.
# ---------------------------------------------------------------------------
def quant_linear_forward(x, weight, bias=None, use_weight_quant=True,
                         wbits=WBITS, group_size=GROUP_SIZE,
                         mxu_dtype=jnp.bfloat16):
    """x: [..., in_f]; weight: [out_f, in_f] (torch layout); bias: [out_f] or None."""
    out_features, in_features = weight.shape
    if bias is None:
        bias = jnp.zeros((out_features,), dtype=jnp.float32)
    lead = x.shape[:-1]
    x2d = x.reshape(-1, in_features)
    out2d = _quant_linear_pallas(
        x2d, weight, bias, quantize=use_weight_quant,
        wbits=wbits, group_size=group_size, mxu_dtype=mxu_dtype)
    return out2d.reshape(*lead, out_features)


# ---------------------------------------------------------------------------
# Demo / correctness checks.
# ---------------------------------------------------------------------------
def _ref_fake_quant(w, wbits=WBITS, group_size=GROUP_SIZE):
    out_f, in_f = w.shape
    qmax = 2 ** wbits - 1
    wg = w.reshape(out_f, in_f // group_size, group_size)
    xmax = wg.max(-1, keepdims=True)
    xmin = wg.min(-1, keepdims=True)
    scale = jnp.maximum(xmax - xmin, 1e-5) / qmax
    zp = jnp.round(-xmin / scale)
    q = jnp.clip(jnp.round(wg / scale) + zp, 0, qmax)
    return ((q - zp) * scale).reshape(out_f, in_f)


if __name__ == "__main__":
    key = jax.random.PRNGKey(0)

    # --- case 1: small aligned-ish shapes -----------------------------------
    batch, seq = 2, 8
    in_features, out_features = 128, 64      # group_size=64 divides in_features
    kx, kw, kb = jax.random.split(key, 3)
    x = jax.random.normal(kx, (batch, seq, in_features), dtype=jnp.float32)
    weight = jax.random.normal(kw, (out_features, in_features), dtype=jnp.float32) * 0.05
    bias = jax.random.normal(kb, (out_features,), dtype=jnp.float32) * 0.1

    out_q = quant_linear_forward(x, weight, bias, use_weight_quant=True)          # bf16 MXU
    out_q_f32 = quant_linear_forward(x, weight, bias, use_weight_quant=True,
                                     mxu_dtype=jnp.float32)                        # exact path
    out_fp = quant_linear_forward(x, weight, bias, use_weight_quant=False,
                                  mxu_dtype=jnp.float32)
    jax.block_until_ready((out_q, out_q_f32, out_fp))

    ref_q = x @ _ref_fake_quant(weight).T + bias
    ref_fp = x @ weight.T + bias
    assert out_q.shape == (batch, seq, out_features)
    assert jnp.allclose(out_q_f32, ref_q, atol=1e-4, rtol=1e-4)
    assert jnp.allclose(out_fp, ref_fp, atol=1e-4, rtol=1e-4)
    assert jnp.allclose(out_q, ref_q, atol=5e-2, rtol=5e-2)

    # --- case 2: non-tile-aligned shapes (padding path): M=18, N=80, K=192 ---
    b2, s2, in2, out2f = 2, 9, 192, 80
    k1, k2, k3 = jax.random.split(jax.random.PRNGKey(1), 3)
    x2 = jax.random.normal(k1, (b2, s2, in2), dtype=jnp.float32)
    w2 = jax.random.normal(k2, (out2f, in2), dtype=jnp.float32) * 0.05
    bb2 = jax.random.normal(k3, (out2f,), dtype=jnp.float32) * 0.1
    out2 = quant_linear_forward(x2, w2, bb2, use_weight_quant=True,
                                mxu_dtype=jnp.float32)
    jax.block_until_ready(out2)
    ref2 = x2 @ _ref_fake_quant(w2).T + bb2
    assert out2.shape == (b2, s2, out2f)
    assert jnp.allclose(out2, ref2, atol=1e-4, rtol=1e-4)

    # --- case 3: multi-K-tile accumulation (K=2048 -> 2 K steps, 2 N tiles) --
    b3, s3, in3, out3f = 2, 16, 2048, 256
    k4, k5, k6 = jax.random.split(jax.random.PRNGKey(2), 3)
    x3 = jax.random.normal(k4, (b3, s3, in3), dtype=jnp.float32)
    w3 = jax.random.normal(k5, (out3f, in3), dtype=jnp.float32) * 0.05
    bb3 = jax.random.normal(k6, (out3f,), dtype=jnp.float32) * 0.1
    out3 = quant_linear_forward(x3, w3, bb3, use_weight_quant=True)                # bf16 MXU
    out3_f32 = quant_linear_forward(x3, w3, bb3, use_weight_quant=True,
                                    mxu_dtype=jnp.float32)
    jax.block_until_ready((out3, out3_f32))
    ref3 = x3 @ _ref_fake_quant(w3).T + bb3
    assert out3.shape == (b3, s3, out3f)
    assert jnp.allclose(out3_f32, ref3, atol=2e-3, rtol=2e-3)
    assert jnp.allclose(out3, ref3, atol=1e-1, rtol=1e-1)

    print("KERNEL_OK")
</pallas_src>

<mosaic_0001>
module attributes {stable_mosaic.version = 11 : i64} {
  func.func @_qlinear_dequant_kernel(%arg0: i32, %arg1: i32, %arg2: i32, %arg3: memref<16x128xbf16, #tpu.memory_space<vmem>>, %arg4: memref<128x128xi8, #tpu.memory_space<vmem>>, %arg5: memref<2x128xf32, #tpu.memory_space<vmem>>, %arg6: memref<2x128xf32, #tpu.memory_space<vmem>>, %arg7: memref<1x128xf32, #tpu.memory_space<vmem>>, %arg8: memref<16x128xf32, #tpu.memory_space<vmem>>, %arg9: memref<16x128xf32, #tpu.memory_space<vmem>>, %arg10: memref<128x128xbf16, #tpu.memory_space<vmem>>) attributes {dimension_semantics = [#tpu.dimension_semantics<parallel>, #tpu.dimension_semantics<parallel>, #tpu.dimension_semantics<arbitrary>], iteration_bounds = array<i64: 1, 1, 1>, scalar_prefetch = 0 : i64, scratch_operands = 2 : i64, tpu.core_type = #tpu.core_type<tc>, window_params = [{transform_indices = @transform_0, window_bounds = array<i64: 16, 128>}, {transform_indices = @transform_1, window_bounds = array<i64: 128, 128>}, {transform_indices = @transform_2, window_bounds = array<i64: 2, 128>}, {transform_indices = @transform_3, window_bounds = array<i64: 2, 128>}, {transform_indices = @transform_4, window_bounds = array<i64: 1, 128>}, {transform_indices = @transform_5, window_bounds = array<i64: 16, 128>}]} {
    %c0_i32 = arith.constant 0 : i32
    %0 = arith.cmpi eq, %arg2, %c0_i32 : i32
    %1 = arith.extui %0 : i1 to i32
    %c0_i32_0 = arith.constant 0 : i32
    %2 = arith.cmpi ne, %1, %c0_i32_0 : i32
    scf.if %2 {
      %cst_24 = arith.constant 0.000000e+00 : f32
      %32 = vector.broadcast %cst_24 : f32 to vector<16x128xf32>
      %c0_25 = arith.constant 0 : index
      %c0_26 = arith.constant 0 : index
      %33 = vector.load %arg9[%c0_25, %c0_26] : memref<16x128xf32, #tpu.memory_space<vmem>>, vector<16x128xf32>
      tpu.vector_store %arg9[%c0_25, %c0_26], %32 {strides = array<i32>} : memref<16x128xf32, #tpu.memory_space<vmem>>, vector<16x128xf32>,
    } else {
    }
    %c0 = arith.constant 0 : index
    %c0_1 = arith.constant 0 : index
    %3 = vector.load %arg4[%c0, %c0_1] : memref<128x128xi8, #tpu.memory_space<vmem>>, vector<64x128xi8>
    %4 = arith.sitofp %3 : vector<64x128xi8> to vector<64x128xf32>
    %c0_2 = arith.constant 0 : index
    %c0_3 = arith.constant 0 : index
    %5 = vector.load %arg5[%c0_2, %c0_3] : memref<2x128xf32, #tpu.memory_space<vmem>>, vector<1x128xf32>
    %c0_4 = arith.constant 0 : index
    %c0_5 = arith.constant 0 : index
    %6 = vector.load %arg6[%c0_4, %c0_5] : memref<2x128xf32, #tpu.memory_space<vmem>>, vector<1x128xf32>
    %7 = vector.broadcast %6 : vector<1x128xf32> to vector<64x128xf32>
    %8 = arith.subf %4, %7 : vector<64x128xf32>
    %9 = vector.broadcast %5 : vector<1x128xf32> to vector<64x128xf32>
    %10 = arith.mulf %8, %9 : vector<64x128xf32>
    %11 = arith.truncf %10 : vector<64x128xf32> to vector<64x128xbf16>
    %c0_6 = arith.constant 0 : index
    %c0_7 = arith.constant 0 : index
    %12 = vector.load %arg10[%c0_6, %c0_7] : memref<128x128xbf16, #tpu.memory_space<vmem>>, vector<64x128xbf16>
    tpu.vector_store %arg10[%c0_6, %c0_7], %11 {strides = array<i32>} : memref<128x128xbf16, #tpu.memory_space<vmem>>, vector<64x128xbf16>,
    %c64 = arith.constant 64 : index
    %c0_8 = arith.constant 0 : index
    %13 = vector.load %arg4[%c64, %c0_8] : memref<128x128xi8, #tpu.memory_space<vmem>>, vector<64x128xi8>
    %14 = arith.sitofp %13 : vector<64x128xi8> to vector<64x128xf32>
    %c1 = arith.constant 1 : index
    %c0_9 = arith.constant 0 : index
    %15 = vector.load %arg5[%c1, %c0_9] : memref<2x128xf32, #tpu.memory_space<vmem>>, vector<1x128xf32>
    %c1_10 = arith.constant 1 : index
    %c0_11 = arith.constant 0 : index
    %16 = vector.load %arg6[%c1_10, %c0_11] : memref<2x128xf32, #tpu.memory_space<vmem>>, vector<1x128xf32>
    %17 = vector.broadcast %16 : vector<1x128xf32> to vector<64x128xf32>
    %18 = arith.subf %14, %17 : vector<64x128xf32>
    %19 = vector.broadcast %15 : vector<1x128xf32> to vector<64x128xf32>
    %20 = arith.mulf %18, %19 : vector<64x128xf32>
    %21 = arith.truncf %20 : vector<64x128xf32> to vector<64x128xbf16>
    %c64_12 = arith.constant 64 : index
    %c0_13 = arith.constant 0 : index
    %22 = vector.load %arg10[%c64_12, %c0_13] : memref<128x128xbf16, #tpu.memory_space<vmem>>, vector<64x128xbf16>
    tpu.vector_store %arg10[%c64_12, %c0_13], %21 {strides = array<i32>} : memref<128x128xbf16, #tpu.memory_space<vmem>>, vector<64x128xbf16>,
    %c0_14 = arith.constant 0 : index
    %c0_15 = arith.constant 0 : index
    %23 = vector.load %arg9[%c0_14, %c0_15] : memref<16x128xf32, #tpu.memory_space<vmem>>, vector<16x128xf32>
    %c0_16 = arith.constant 0 : index
    %c0_17 = arith.constant 0 : index
    %24 = vector.load %arg3[%c0_16, %c0_17] : memref<16x128xbf16, #tpu.memory_space<vmem>>, vector<16x128xbf16>
    %c0_18 = arith.constant 0 : index
    %c0_19 = arith.constant 0 : index
    %25 = vector.load %arg10[%c0_18, %c0_19] : memref<128x128xbf16, #tpu.memory_space<vmem>>, vector<128x128xbf16>
    %cst = arith.constant dense<0.000000e+00> : vector<16x128xf32>
    %26 = tpu.matmul %24, %25, %cst {dimension_numbers = #tpu.dot_dimension_numbers<[1], [0], [0], [1], [0, 0, 1, 1], [], []>} : vector<16x128xbf16>, vector<128x128xbf16>, vector<16x128xf32> -> vector<16x128xf32>
    %27 = arith.addf %23, %26 : vector<16x128xf32>
    %c0_20 = arith.constant 0 : index
    %c0_21 = arith.constant 0 : index
    %28 = vector.load %arg9[%c0_20, %c0_21] : memref<16x128xf32, #tpu.memory_space<vmem>>, vector<16x128xf32>
    tpu.vector_store %arg9[%c0_20, %c0_21], %27 {strides = array<i32>} : memref<16x128xf32, #tpu.memory_space<vmem>>, vector<16x128xf32>,
    %c0_i32_22 = arith.constant 0 : i32
    %29 = arith.cmpi eq, %arg2, %c0_i32_22 : i32
    %30 = arith.extui %29 : i1 to i32
    %c0_i32_23 = arith.constant 0 : i32
    %31 = arith.cmpi ne, %30, %c0_i32_23 : i32
    scf.if %31 {
      %c0_24 = arith.constant 0 : index
      %c0_25 = arith.constant 0 : index
      %32 = vector.load %arg9[%c0_24, %c0_25] : memref<16x128xf32, #tpu.memory_space<vmem>>, vector<16x128xf32>
      %c0_26 = arith.constant 0 : index
      %c0_27 = arith.constant 0 : index
      %33 = vector.load %arg7[%c0_26, %c0_27] : memref<1x128xf32, #tpu.memory_space<vmem>>, vector<1x128xf32>
      %34 = vector.broadcast %33 : vector<1x128xf32> to vector<16x128xf32>
      %35 = arith.addf %32, %34 : vector<16x128xf32>
      %c0_28 = arith.constant 0 : index
      %c0_29 = arith.constant 0 : index
      %36 = vector.load %arg8[%c0_28, %c0_29] : memref<16x128xf32, #tpu.memory_space<vmem>>, vector<16x128xf32>
      tpu.vector_store %arg8[%c0_28, %c0_29], %35 {strides = array<i32>} : memref<16x128xf32, #tpu.memory_space<vmem>>, vector<16x128xf32>,
    } else {
    }
    return
  }
  func.func @transform_0(%arg0: i32, %arg1: i32, %arg2: i32) -> (i32, i32) {
    %c0_i32 = arith.constant 0 : i32
    return %arg0, %arg2 : i32, i32
  }
  func.func @transform_1(%arg0: i32, %arg1: i32, %arg2: i32) -> (i32, i32) {
    %c0_i32 = arith.constant 0 : i32
    return %arg2, %arg1 : i32, i32
  }
  func.func @transform_2(%arg0: i32, %arg1: i32, %arg2: i32) -> (i32, i32) {
    %c0_i32 = arith.constant 0 : i32
    return %arg2, %arg1 : i32, i32
  }
  func.func @transform_3(%arg0: i32, %arg1: i32, %arg2: i32) -> (i32, i32) {
    %c0_i32 = arith.constant 0 : i32
    return %arg2, %arg1 : i32, i32
  }
  func.func @transform_4(%arg0: i32, %arg1: i32, %arg2: i32) -> (i32, i32) {
    %c0_i32 = arith.constant 0 : i32
    %c0_i32_0 = arith.constant 0 : i32
    return %c0_i32, %arg1 : i32, i32
  }
  func.func @transform_5(%arg0: i32, %arg1: i32, %arg2: i32) -> (i32, i32) {
    %c0_i32 = arith.constant 0 : i32
    return %arg0, %arg1 : i32, i32
  }
}

</mosaic_0001>

<bundles_post_ra>
// kernel: tpu_custom_call.1
= control target key start
LH: loop header
LB: loop body
LE: loop exit
PB: predicated region body
PF: predicated region fallthrough
CT: control target
= control target key end

     0   :  { %10 = vsyncpa [#allocation5], 0  ;;  %s577_s0 = inlined_call_operand.hbm [shape: bf16[16,128], index: 0, kind: input, shape index: {}]   ;;  %s578_s1 = inlined_call_operand.hbm [shape: s8[128,128], index: 1, kind: input, shape index: {}]   ;;  %s579_s2 = inlined_call_operand.hbm [shape: f32[2,128], index: 2, kind: input, shape index: {}]   ;;  %s580_s3 = inlined_call_operand.vmem [shape: f32[2,128], index: 3, kind: input, shape index: {}]   ;;  %s581_s4 = inlined_call_operand.vmem [shape: f32[1,128], index: 4, kind: input, shape index: {}]   ;;  %s582_s5 = inlined_call_operand.hbm [shape: f32[16,128], index: 5, kind: output, shape index: {}]  }
   0x1   :  { %11 = vsyncpa [#allocation8], 0  ;;  %s30_s20 = sshll.u32 %s578_s1, 4  ;;  %s31_s20 = int_to_ptr.hbm [resolvable:$true] %s30_s20 }
   0x2   :  { %12 = vsyncpa [#allocation6], 0  ;;  %s512_s21 = smov [#allocation7]   ;;  %s17_s25 = sshll.u32 %s577_s0, 4  ;;  %s18_s25 = int_to_ptr.hbm [resolvable:$true] %s17_s25 }
   0x3   :  { %s32_s22 = sshll.u32 %s512_s21, 4  ;;  %s513_s26 = smov 128   ;;  %s33_s22 = int_to_ptr.vmem [resolvable:$true] %s32_s22 }
   0x4   :  { %s514_s27 = smov 8   ;;  %s515_s28 = smov [#allocation4]  }
   0x5   :  { %38 = dma.hbm_to_vmem [thread:$0]  %s31_s20, 512, %s33_s22, [#allocation8], %s513_s26, %s513_s26, %s514_s27  }
   0x6   :  { %s19_s29 = sshll.u32 %s515_s28, 4  ;;  %s516_s1 = smov 64   ;;  %s20_s29 = int_to_ptr.vmem [resolvable:$true] %s19_s29 }
   0x7   :  { %s517_s30 = smov 4   ;;  %s44_s8 = sshll.u32 %s579_s2, 4  ;;  %s45_s8 = int_to_ptr.hbm [resolvable:$true] %s44_s8 }
   0x8   :  { %25 = dma.hbm_to_vmem [thread:$0]  %s18_s25, 128, %s20_s29, [#allocation5], %s516_s1, %s516_s1, %s517_s30  }
   0x9   :  { %s518_s9 = smov [#allocation9]  }
   0xa   :  { %s46_s0 = sshll.u32 %s518_s9, 4  ;;  %s47_s0 = int_to_ptr.vmem [resolvable:$true] %s46_s0 }
   0xb   :  { %49 = dma.hbm_to_vmem [thread:$0]  %s45_s8, 32, %s47_s0, [#allocation8]  }
   0xc   :  { %506 = dma.done.wait [#allocation5], 128  }
   0xd   :  { %507 = vsyncadd [#allocation5], 4294967168 }
   0xe   :  { %508 = dma.done.wait [#allocation8], 544  }
   0xf   :  { %509 = vsyncadd [#allocation8], 4294966752  ;;  %v127_v0 = vld [vmem:[#allocation7 + $0x18] sm:$0xff]  ;;  %v126_v6 = vld [vmem:[#allocation7 + $0x10] sm:$0xff]  ;;  %s519_s14 = smov [#allocation10]   ;;  %s291_s18 = sshll.u32 %s582_s5, 4  ;;  %s292_s18 = int_to_ptr.hbm [resolvable:$true] %s291_s18 }
  0x10   :  { %v134_v1 = vunpack.c.2.s8 %v127_v0  ;;  %v135_v2 = vunpack.c.3.s8 %v127_v0  ;;  %v405_v3 = vld [vmem:[%s580_s3 + $0x1] ss:$0 sm:$0xff]  ;;  %v132_v4 = vunpack.c.0.s8 %v127_v0  ;;  %v133_v5 = vunpack.c.1.s8 %v127_v0  ;;  %v406_v13 = vld [vmem:[#allocation9 + $0x1] ss:$0 sm:$0xff]  ;;  %v73_v28 = vld [vmem:[#allocation7 + $0x8] sm:$0xff]  ;;  %s289_s15 = sshll.u32 %s519_s14, 4  ;;  %s290_s15 = int_to_ptr.vmem [resolvable:$true] %s289_s15 }
  0x11   :  { %v130_v7 = vunpack.c.2.s8 %v126_v6  ;;  %v131_v8 = vunpack.c.3.s8 %v126_v6  ;;  %v128_v9 = vunpack.c.0.s8 %v126_v6  ;;  %v129_v10 = vunpack.c.1.s8 %v126_v6  ;;  %v72_v37 = vld [vmem:[#allocation7] sm:$0xff]  ;;  %v407_v42 = vld [vmem:[%s580_s3] ss:$0 sm:$0xff] }
  0x12   :  { %v142_v11 = vcvt.s32.f32 %v134_v1  ;;  %v143_v12 = vcvt.s32.f32 %v135_v2  ;;  %v140_v14 = vcvt.s32.f32 %v132_v4  ;;  %v141_v15 = vcvt.s32.f32 %v133_v5  ;;  %v408_v49 = vld [vmem:[#allocation9] ss:$0 sm:$0xff] }
  0x13   :  { %v138_v16 = vcvt.s32.f32 %v130_v7  ;;  %v139_v17 = vcvt.s32.f32 %v131_v8  ;;  %v136_v18 = vcvt.s32.f32 %v128_v9  ;;  %v137_v19 = vcvt.s32.f32 %v129_v10 }
  0x14   :  { %v153_v20 = vsub.f32 %v142_v11, %v405_v3  ;;  %v154_v21 = vsub.f32 %v143_v12, %v405_v3  ;;  %v151_v22 = vsub.f32 %v140_v14, %v405_v3  ;;  %v152_v23 = vsub.f32 %v141_v15, %v405_v3 }
  0x15   :  { %v149_v24 = vsub.f32 %v138_v16, %v405_v3  ;;  %v150_v25 = vsub.f32 %v139_v17, %v405_v3  ;;  %v147_v26 = vsub.f32 %v136_v18, %v405_v3  ;;  %v148_v27 = vsub.f32 %v137_v19, %v405_v3 }
  0x16   :  { %v162_v29 = vmul.f32 %v406_v13, %v153_v20  ;;  %v163_v30 = vmul.f32 %v406_v13, %v154_v21  ;;  %v160_v31 = vmul.f32 %v406_v13, %v151_v22  ;;  %v161_v32 = vmul.f32 %v406_v13, %v152_v23 }
  0x17   :  { %v158_v33 = vmul.f32 %v406_v13, %v149_v24  ;;  %v159_v34 = vmul.f32 %v406_v13, %v150_v25  ;;  %v156_v35 = vmul.f32 %v406_v13, %v147_v26  ;;  %v157_v36 = vmul.f32 %v406_v13, %v148_v27  ;;  %v341_v24 = vld [vmem:[#allocation4] sm:$0xff] }
  0x18   :  { %v388_v38 = vpack.c.bf16 %v163_v30, %v162_v29  ;;  %v383_v39 = vpack.c.bf16 %v161_v32, %v160_v31  ;;  %v80_v40 = vunpack.c.2.s8 %v73_v28  ;;  %v81_v41 = vunpack.c.3.s8 %v73_v28  ;;  %v409_v25 = vld [vmem:[%s581_s4] ss:$0 sm:$0xff] }
  0x19   :  { %v378_v43 = vpack.c.bf16 %v159_v34, %v158_v33  ;;  %v373_v44 = vpack.c.bf16 %v157_v36, %v156_v35  ;;  %v78_v45 = vunpack.c.0.s8 %v73_v28  ;;  %v79_v46 = vunpack.c.1.s8 %v73_v28 }
  0x1a   :  { %396 = vst [vmem:[#allocation3 + $0x38] sm:$0xff] %v388_v38   ;;  %v88_v47 = vcvt.s32.f32 %v80_v40  ;;  %v89_v48 = vcvt.s32.f32 %v81_v41  ;;  %v76_v50 = vunpack.c.2.s8 %v72_v37  ;;  %v77_v51 = vunpack.c.3.s8 %v72_v37 }
  0x1b   :  { %395 = vst [vmem:[#allocation3 + $0x28] sm:$0xff] %v383_v39   ;;  %v86_v52 = vcvt.s32.f32 %v78_v45  ;;  %v87_v53 = vcvt.s32.f32 %v79_v46  ;;  %v74_v54 = vunpack.c.0.s8 %v72_v37  ;;  %v75_v55 = vunpack.c.1.s8 %v72_v37 }
  0x1c   :  { %394 = vst [vmem:[#allocation3 + $0x20] sm:$0xff] %v378_v43   ;;  %v99_v56 = vsub.f32 %v88_v47, %v407_v42  ;;  %v100_v57 = vsub.f32 %v89_v48, %v407_v42  ;;  %v84_v58 = vcvt.s32.f32 %v76_v50  ;;  %v85_v59 = vcvt.s32.f32 %v77_v51 }
  0x1d   :  { %393 = vst [vmem:[#allocation3 + $0x8] sm:$0xff] %v373_v44   ;;  %v97_v60 = vsub.f32 %v86_v52, %v407_v42  ;;  %v98_v61 = vsub.f32 %v87_v53, %v407_v42  ;;  %v82_v62 = vcvt.s32.f32 %v74_v54  ;;  %v83_v63 = vcvt.s32.f32 %v75_v55 }
  0x1e   :  { %v108_v0 = vmul.f32 %v408_v49, %v99_v56  ;;  %v109_v1 = vmul.f32 %v408_v49, %v100_v57  ;;  %v95_v2 = vsub.f32 %v84_v58, %v407_v42  ;;  %v96_v3 = vsub.f32 %v85_v59, %v407_v42 }
  0x1f   :  { %v106_v4 = vmul.f32 %v408_v49, %v97_v60  ;;  %v107_v5 = vmul.f32 %v408_v49, %v98_v61  ;;  %v93_v6 = vsub.f32 %v82_v62, %v407_v42  ;;  %v94_v7 = vsub.f32 %v83_v63, %v407_v42 }
  0x20   :  { %v368_v8 = vpack.c.bf16 %v109_v1, %v108_v0  ;;  %v104_v9 = vmul.f32 %v408_v49, %v95_v2  ;;  %v105_v10 = vmul.f32 %v408_v49, %v96_v3 }
  0x21   :  { %v349_v11 = vld [vmem:[#allocation3 + $0x38] sm:$0xff]  ;;  %v363_v12 = vpack.c.bf16 %v107_v5, %v106_v4  ;;  %v102_v13 = vmul.f32 %v408_v49, %v93_v6  ;;  %v103_v14 = vmul.f32 %v408_v49, %v94_v7 }
  0x22   :  { %392 = vst [vmem:[#allocation3 + $0x10] sm:$0xff] %v368_v8   ;;  %v358_v15 = vpack.c.bf16 %v105_v10, %v104_v9  ;;  %254 = vmatpush.bf16.msra.mxu0 %v349_v11  ;;  %v348_v16 = vld [vmem:[#allocation3 + $0x28] sm:$0xff] }
  0x23   :  { %391 = vst [vmem:[#allocation3 + $0x18] sm:$0xff] %v363_v12   ;;  %v353_v17 = vpack.c.bf16 %v103_v14, %v102_v13  ;;  %v347_v18 = vld [vmem:[#allocation3 + $0x20] sm:$0xff] }
  0x24   :  { %390 = vst [vmem:[#allocation3] sm:$0xff] %v358_v15   ;;  %v346_v19 = vld [vmem:[#allocation3 + $0x8] sm:$0xff] }
  0x25   :  { %354 = vst [vmem:[#allocation3 + $0x30] sm:$0xff] %v353_v17  }
  0x26   :  { %255 = vmatpush.bf16.msra.mxu0 %v348_v16 }
  0x29   :  { %v345_v20 = vld [vmem:[#allocation3 + $0x10] sm:$0xff] }
  0x2a   :  { %256 = vmatpush.bf16.msra.mxu0 %v347_v18  ;;  %v344_v21 = vld [vmem:[#allocation3 + $0x18] sm:$0xff] }
  0x2b   :  { %v343_v22 = vld [vmem:[#allocation3] sm:$0xff] }
  0x2c   :  { %v342_v23 = vld [vmem:[#allocation3 + $0x30] sm:$0xff] }
  0x2e   :  { %257 = vmatpush.bf16.msra.mxu0 %v346_v19 }
  0x32   :  { %258 = vmatpush.bf16.msra.mxu0 %v345_v20 }
  0x36   :  { %259 = vmatpush.bf16.msra.mxu0 %v344_v21 }
  0x3a   :  { %260 = vmatpush.bf16.msra.mxu0 %v343_v22 }
  0x3e   :  { %261 = vmatpush.bf16.msra.mxu0 %v342_v23 }
  0x41   :  { %262 = vmatmul.bf16.vlgmr.msra.gmra.mxu0 %v341_v24 }
  0xbe   :  { %v263_v26 = vpop.f32.mrf.mxu0 }
  0xbf   :  { %v281_v27 = vadd.f32 %v409_v25, %v263_v26 }
  0xc1   :  { %283 = vst [vmem:[#allocation10] sm:$0xff] %v281_v27 }
  0xc6   :  { %v265_v28 = vpop.f32.mrf.mxu0 }
  0xc7   :  { %v282_v29 = vadd.f32 %v409_v25, %v265_v28 }
  0xc9   :  { %284 = vst [vmem:[#allocation10 + $0x8] sm:$0xff] %v282_v29 }
  0xca   :  { %297 = dma.vmem_to_hbm [thread:$0]  %s290_s15, 256, %s292_s18, [#allocation6], %s513_s26, %s513_s26, %s514_s27  }
  0xcb   :  { %510 = dma.done.wait [#allocation6], 256  }
  0xcc   :  { %511 = vsyncadd [#allocation6], 4294967040 }
  0xcd   :  { %302 = vsyncpa [#allocation5], 1 }
  0xce   :  { %303 = vsyncpa [#allocation8], 1 }
  0xcf   :  { %304 = vsyncpa [#allocation6], 1 }

</bundles_post_ra>
